<compile_context>
chip_gen: v7x
topology: tpu7x:2x2x1
jax: 0.10.0
libtpu: 0.0.40
codegen_flags: <defaults>
</compile_context>

<pallas_src>
import functools

import jax
import jax.numpy as jnp
from jax.experimental import pallas as pl
from jax.experimental.pallas import tpu as pltpu

LOG_STD_MIN = -10.0
LOG_STD_MAX = 2.0
LOG_STD_SCALE = 0.5 * (LOG_STD_MAX - LOG_STD_MIN)      # 6.0
LOG_STD_SHIFT = LOG_STD_MIN + LOG_STD_SCALE            # -4.0


def _round_up(x, m):
    return (x + m - 1) // m * m


def actor_kernel(x_ref, w1_ref, b1_ref, w2_ref, b2_ref, wh_ref, bh_ref,
                 out_ref, *, action_dim):
    """One batch tile: 2x (linear + relu) + fused [mean | log_std] head.

    Output lanes [0, A)  : mu
    Output lanes [A, 2A) : std = exp(6*tanh(z) - 4)
    Output lanes [2A, ..): padding (sliced off in the wrapper)
    """
    cd = w1_ref.dtype                        # MXU compute dtype

    x = x_ref[...]

    # linear1 + relu (f32 accumulation, bias added on the f32 accumulator)
    h1 = jnp.dot(x, w1_ref[...], preferred_element_type=jnp.float32) + b1_ref[...]
    h1 = jnp.maximum(h1, 0.0).astype(cd)

    # linear2 + relu
    h2 = jnp.dot(h1, w2_ref[...], preferred_element_type=jnp.float32) + b2_ref[...]
    h2 = jnp.maximum(h2, 0.0).astype(cd)

    # fused heads: single MXU pass over one lane slab
    heads = jnp.dot(h2, wh_ref[...], preferred_element_type=jnp.float32) + bh_ref[...]

    # Compute the std epilogue on every lane (tanh/exp sit on the EUP slot,
    # essentially free), then lane-select: lanes [A, 2A) take the std value,
    # everything else keeps the raw head (mu / zero padding).
    std_all = jnp.exp(LOG_STD_SCALE * jnp.tanh(heads) + LOG_STD_SHIFT)
    lane = jax.lax.broadcasted_iota(jnp.int32, heads.shape, dimension=1)
    is_std = (lane >= action_dim) & (lane < 2 * action_dim)
    out_ref[...] = jnp.where(is_std, std_all, heads).astype(out_ref.dtype)


def prepare_params(params, *, compute_dtype=jnp.bfloat16):
    """One-time parameter prep: pad, cast, and fuse the two heads.

    Weights are stored pre-transposed as (in, out) so the kernel computes
    y = x @ W + b (== PyTorch's x @ W.T + b).  Zero padding is exact.
    """
    F, H = params["w1"].shape
    A = params["wm"].shape[1]
    F_pad = _round_up(F, 8)                  # sublane-multiple only (no 128 lane pad)
    H_pad = _round_up(H, 128)
    head_cols = _round_up(2 * A, 128)        # both heads share one lane slab
    cd = compute_dtype

    def pad2(x, rows, cols, dtype):
        x = x.astype(dtype)
        return jnp.pad(x, ((0, rows - x.shape[0]), (0, cols - x.shape[1])))

    wh = jnp.zeros((H_pad, head_cols), cd)
    wh = wh.at[:H, 0:A].set(params["wm"].astype(cd))
    wh = wh.at[:H, A:2 * A].set(params["ws"].astype(cd))
    bh = jnp.zeros((1, head_cols), jnp.float32)
    bh = bh.at[:, 0:A].set(params["bm"].astype(jnp.float32))
    bh = bh.at[:, A:2 * A].set(params["bs"].astype(jnp.float32))

    return {
        "w1": pad2(params["w1"], F_pad, H_pad, cd),
        "b1": pad2(params["b1"], 1, H_pad, jnp.float32),
        "w2": pad2(params["w2"], H_pad, H_pad, cd),
        "b2": pad2(params["b2"], 1, H_pad, jnp.float32),
        "wh": wh,
        "bh": bh,
        "dims": (F, H, A, F_pad, H_pad, head_cols),
        "compute_dtype": cd,
    }


def actor_forward(obs, prep, *, tile_b=512, out_dtype=None):
    """Returns (mu, std) — the parameters of the SquashedNormal the PyTorch
    module constructs. (The distribution object itself has no kernel analog.)"""
    B, F = obs.shape
    F_real, H, A, F_pad, H_pad, head_cols = prep["dims"]
    assert F == F_real, "obs feature dim does not match prepared params"
    cd = prep["compute_dtype"]
    out_dtype = cd if out_dtype is None else out_dtype

    # Sublane granularity: sub-32-bit dtypes pack 16 rows per vreg.
    sub = 16 if (jnp.dtype(cd).itemsize < 4 or jnp.dtype(out_dtype).itemsize < 4) else 8
    b_sub = _round_up(B, sub)
    tile_b = min(_round_up(tile_b, sub), b_sub)
    # v7x has 2 TensorCores: for large batches ensure >= 2 grid steps along the
    # "parallel" axis so both cores get work (negligible cost on 1-TC parts).
    if b_sub >= 512:
        tile_b = min(tile_b, _round_up(pl.cdiv(b_sub, 2), sub))
    B_pad = _round_up(B, tile_b)
    grid_b = B_pad // tile_b

    x_p = obs.astype(cd)
    if B_pad != B or F_pad != F:
        x_p = jnp.pad(x_p, ((0, B_pad - B), (0, F_pad - F)))

    const = lambda i: (0, 0)                 # weights: resident VMEM block every step
    batch = lambda i: (i, 0)

    cd_bytes = jnp.dtype(cd).itemsize
    out_bytes = jnp.dtype(out_dtype).itemsize
    weight_bytes = sum(int(prep[k].size) * prep[k].dtype.itemsize
                       for k in ("w1", "b1", "w2", "b2", "wh", "bh"))

    # Scoped-VMEM budget sized from the actual footprint (v7x: 64 MiB/TC):
    # weights x2 pipeline buffers + double-buffered obs/out tiles + f32
    # intermediates, plus a few MiB of slack.
    io_bytes = 2 * tile_b * (F_pad * cd_bytes + head_cols * out_bytes)
    interm_bytes = 4 * tile_b * (2 * H_pad + 4 * head_cols)
    vmem_limit = 2 * weight_bytes + io_bytes + 2 * interm_bytes + (4 << 20)
    vmem_limit = int(min(max(vmem_limit, 16 << 20), 64 << 20))

    flops = 2 * B_pad * (F_pad * H_pad + H_pad * H_pad + H_pad * head_cols)
    bytes_accessed = (B_pad * F_pad * cd_bytes + weight_bytes
                      + B_pad * head_cols * out_bytes)

    out = pl.pallas_call(
        functools.partial(actor_kernel, action_dim=A),
        out_shape=jax.ShapeDtypeStruct((B_pad, head_cols), out_dtype),
        grid_spec=pltpu.PrefetchScalarGridSpec(
            num_scalar_prefetch=0,
            grid=(grid_b,),
            in_specs=[
                pl.BlockSpec((tile_b, F_pad), batch),        # obs tile (F only 8-padded)
                pl.BlockSpec((F_pad, H_pad), const),         # w1
                pl.BlockSpec((1, H_pad), const),             # b1 (f32)
                pl.BlockSpec((H_pad, H_pad), const),         # w2
                pl.BlockSpec((1, H_pad), const),             # b2 (f32)
                pl.BlockSpec((H_pad, head_cols), const),     # fused head weights
                pl.BlockSpec((1, head_cols), const),         # fused head biases (f32)
            ],
            out_specs=pl.BlockSpec((tile_b, head_cols), batch),  # [mu|std|pad], lane-dense
        ),
        compiler_params=pltpu.CompilerParams(
            dimension_semantics=("parallel",),
            vmem_limit_bytes=vmem_limit,
        ),
        cost_estimate=pl.CostEstimate(
            flops=flops,
            transcendentals=2 * B_pad * head_cols,
            bytes_accessed=bytes_accessed,
        ),
    )(x_p, prep["w1"], prep["b1"], prep["w2"], prep["b2"], prep["wh"], prep["bh"])

    mu = out[:B, :A]
    std = out[:B, A:2 * A]
    return mu, std


def init_params(key, n_features, hidden_size, action_dim):
    """Deterministic orthogonal weights / zero biases, mirroring Actor.__init__."""
    ortho = jax.nn.initializers.orthogonal()
    k1, k2, k3, k4 = jax.random.split(key, 4)
    # PyTorch Linear weight is (out, in); store transposed (in, out) for x @ W.
    return {
        "w1": ortho(k1, (n_features, hidden_size), jnp.float32),
        "b1": jnp.zeros((1, hidden_size), jnp.float32),
        "w2": ortho(k2, (hidden_size, hidden_size), jnp.float32),
        "b2": jnp.zeros((1, hidden_size), jnp.float32),
        "wm": ortho(k3, (hidden_size, action_dim), jnp.float32),
        "bm": jnp.zeros((1, action_dim), jnp.float32),
        "ws": ortho(k4, (hidden_size, action_dim), jnp.float32),
        "bs": jnp.zeros((1, action_dim), jnp.float32),
    }


def actor_forward_ref(obs, params, compute_dtype=jnp.float32):
    """Pure-JAX reference at a given MXU compute dtype (f32 accumulation)."""
    cd = compute_dtype
    x = obs.astype(cd)
    h1 = jnp.dot(x, params["w1"].astype(cd), preferred_element_type=jnp.float32) + params["b1"]
    h1 = jnp.maximum(h1, 0.0).astype(cd)
    h2 = jnp.dot(h1, params["w2"].astype(cd), preferred_element_type=jnp.float32) + params["b2"]
    h2 = jnp.maximum(h2, 0.0).astype(cd)
    mu = jnp.dot(h2, params["wm"].astype(cd), preferred_element_type=jnp.float32) + params["bm"]
    log_std = jnp.dot(h2, params["ws"].astype(cd), preferred_element_type=jnp.float32) + params["bs"]
    log_std = jnp.tanh(log_std)
    log_std = LOG_STD_MIN + 0.5 * (LOG_STD_MAX - LOG_STD_MIN) * (log_std + 1.0)
    return mu, jnp.exp(log_std)


if __name__ == "__main__":
    # Small, module-consistent shapes: batch=8, n_features=32, hidden=64, action_dim=8
    B, F, H, A = 8, 32, 64, 8
    key = jax.random.PRNGKey(0)
    k_obs, k_par = jax.random.split(key)
    obs = jax.random.normal(k_obs, (B, F), dtype=jnp.float32)
    params = init_params(k_par, F, H, A)

    # Exact path (f32 MXU inputs, f32 outputs) vs f32 reference — module semantics.
    prep32 = prepare_params(params, compute_dtype=jnp.float32)
    mu32, std32 = actor_forward(obs, prep32, out_dtype=jnp.float32)
    mu32, std32 = jax.block_until_ready((mu32, std32))
    mu_ref32, std_ref32 = actor_forward_ref(obs, params, jnp.float32)
    assert jnp.allclose(mu32, mu_ref32, atol=1e-5, rtol=1e-5)
    assert jnp.allclose(std32, std_ref32, atol=1e-5, rtol=1e-5)

    # Fast path: bf16 MXU inputs + bf16 outputs (f32 accumulation / epilogue)
    # vs a same-compute-precision reference.
    prep_bf = prepare_params(params, compute_dtype=jnp.bfloat16)
    mu_bf, std_bf = actor_forward(obs, prep_bf)          # out_dtype defaults to bf16
    mu_bf, std_bf = jax.block_until_ready((mu_bf, std_bf))
    mu_ref_bf, std_ref_bf = actor_forward_ref(obs, params, jnp.bfloat16)
    assert jnp.allclose(mu_bf.astype(jnp.float32), mu_ref_bf, atol=1e-2, rtol=1e-2)
    assert jnp.allclose(std_bf.astype(jnp.float32), std_ref_bf, atol=1e-2, rtol=1e-2)

    # TODO(synk): the PyTorch module returns a SquashedNormal distribution object;
    # the kernel returns its parameters (mu, std) — sampling/log_prob stay in host JAX.
    print("KERNEL_OK")
</pallas_src>

<mosaic_0001>
module attributes {stable_mosaic.version = 11 : i64} {
  func.func @actor_kernel(%arg0: i32, %arg1: memref<8x32xf32, #tpu.memory_space<vmem>>, %arg2: memref<32x128xf32, #tpu.memory_space<vmem>>, %arg3: memref<1x128xf32, #tpu.memory_space<vmem>>, %arg4: memref<128x128xf32, #tpu.memory_space<vmem>>, %arg5: memref<1x128xf32, #tpu.memory_space<vmem>>, %arg6: memref<128x128xf32, #tpu.memory_space<vmem>>, %arg7: memref<1x128xf32, #tpu.memory_space<vmem>>, %arg8: memref<8x128xf32, #tpu.memory_space<vmem>>) attributes {dimension_semantics = [#tpu.dimension_semantics<parallel>], iteration_bounds = array<i64: 1>, scalar_prefetch = 0 : i64, scratch_operands = 0 : i64, tpu.core_type = #tpu.core_type<tc>, window_params = [{transform_indices = @transform_0, window_bounds = array<i64: 8, 32>}, {pipeline_mode = #tpu.pipeline_mode<synchronous>, transform_indices = @transform_1, window_bounds = array<i64: 32, 128>}, {pipeline_mode = #tpu.pipeline_mode<synchronous>, transform_indices = @transform_2, window_bounds = array<i64: 1, 128>}, {pipeline_mode = #tpu.pipeline_mode<synchronous>, transform_indices = @transform_3, window_bounds = array<i64: 128, 128>}, {pipeline_mode = #tpu.pipeline_mode<synchronous>, transform_indices = @transform_4, window_bounds = array<i64: 1, 128>}, {pipeline_mode = #tpu.pipeline_mode<synchronous>, transform_indices = @transform_5, window_bounds = array<i64: 128, 128>}, {pipeline_mode = #tpu.pipeline_mode<synchronous>, transform_indices = @transform_6, window_bounds = array<i64: 1, 128>}, {transform_indices = @transform_7, window_bounds = array<i64: 8, 128>}]} {
    %c0 = arith.constant 0 : index
    %c0_0 = arith.constant 0 : index
    %0 = vector.load %arg1[%c0, %c0_0] : memref<8x32xf32, #tpu.memory_space<vmem>>, vector<8x32xf32>
    %c0_1 = arith.constant 0 : index
    %c0_2 = arith.constant 0 : index
    %1 = vector.load %arg2[%c0_1, %c0_2] : memref<32x128xf32, #tpu.memory_space<vmem>>, vector<32x128xf32>
    %cst = arith.constant dense<0.000000e+00> : vector<8x128xf32>
    %2 = tpu.matmul %0, %1, %cst {dimension_numbers = #tpu.dot_dimension_numbers<[1], [0], [0], [1], [0, 0, 1, 1], [], []>} : vector<8x32xf32>, vector<32x128xf32>, vector<8x128xf32> -> vector<8x128xf32>
    %c0_3 = arith.constant 0 : index
    %c0_4 = arith.constant 0 : index
    %3 = vector.load %arg3[%c0_3, %c0_4] : memref<1x128xf32, #tpu.memory_space<vmem>>, vector<1x128xf32>
    %4 = vector.broadcast %3 : vector<1x128xf32> to vector<8x128xf32>
    %5 = arith.addf %2, %4 : vector<8x128xf32>
    %cst_5 = arith.constant 0.000000e+00 : f32
    %6 = vector.broadcast %cst_5 : f32 to vector<8x128xf32>
    %7 = arith.maximumf %5, %6 : vector<8x128xf32>
    %c0_6 = arith.constant 0 : index
    %c0_7 = arith.constant 0 : index
    %8 = vector.load %arg4[%c0_6, %c0_7] : memref<128x128xf32, #tpu.memory_space<vmem>>, vector<128x128xf32>
    %cst_8 = arith.constant dense<0.000000e+00> : vector<8x128xf32>
    %9 = tpu.matmul %7, %8, %cst_8 {dimension_numbers = #tpu.dot_dimension_numbers<[1], [0], [0], [1], [0, 0, 1, 1], [], []>} : vector<8x128xf32>, vector<128x128xf32>, vector<8x128xf32> -> vector<8x128xf32>
    %c0_9 = arith.constant 0 : index
    %c0_10 = arith.constant 0 : index
    %10 = vector.load %arg5[%c0_9, %c0_10] : memref<1x128xf32, #tpu.memory_space<vmem>>, vector<1x128xf32>
    %11 = vector.broadcast %10 : vector<1x128xf32> to vector<8x128xf32>
    %12 = arith.addf %9, %11 : vector<8x128xf32>
    %cst_11 = arith.constant 0.000000e+00 : f32
    %13 = vector.broadcast %cst_11 : f32 to vector<8x128xf32>
    %14 = arith.maximumf %12, %13 : vector<8x128xf32>
    %c0_12 = arith.constant 0 : index
    %c0_13 = arith.constant 0 : index
    %15 = vector.load %arg6[%c0_12, %c0_13] : memref<128x128xf32, #tpu.memory_space<vmem>>, vector<128x128xf32>
    %cst_14 = arith.constant dense<0.000000e+00> : vector<8x128xf32>
    %16 = tpu.matmul %14, %15, %cst_14 {dimension_numbers = #tpu.dot_dimension_numbers<[1], [0], [0], [1], [0, 0, 1, 1], [], []>} : vector<8x128xf32>, vector<128x128xf32>, vector<8x128xf32> -> vector<8x128xf32>
    %c0_15 = arith.constant 0 : index
    %c0_16 = arith.constant 0 : index
    %17 = vector.load %arg7[%c0_15, %c0_16] : memref<1x128xf32, #tpu.memory_space<vmem>>, vector<1x128xf32>
    %18 = vector.broadcast %17 : vector<1x128xf32> to vector<8x128xf32>
    %19 = arith.addf %16, %18 : vector<8x128xf32>
    %20 = math.tanh %19 : vector<8x128xf32>
    %cst_17 = arith.constant 6.000000e+00 : f32
    %21 = vector.broadcast %cst_17 : f32 to vector<8x128xf32>
    %22 = arith.mulf %21, %20 : vector<8x128xf32>
    %cst_18 = arith.constant -4.000000e+00 : f32
    %23 = vector.broadcast %cst_18 : f32 to vector<8x128xf32>
    %24 = arith.addf %22, %23 : vector<8x128xf32>
    %25 = math.exp %24 : vector<8x128xf32>
    %26 = tpu.iota {dimensions = array<i32: 1>} : vector<8x128xi32>
    %c8_i32 = arith.constant 8 : i32
    %27 = vector.broadcast %c8_i32 : i32 to vector<8x128xi32>
    %28 = arith.cmpi sge, %26, %27 : vector<8x128xi32>
    %c16_i32 = arith.constant 16 : i32
    %29 = vector.broadcast %c16_i32 : i32 to vector<8x128xi32>
    %30 = arith.cmpi slt, %26, %29 : vector<8x128xi32>
    %31 = arith.andi %28, %30 : vector<8x128xi1>
    %32 = arith.select %31, %25, %19 : vector<8x128xi1>, vector<8x128xf32>
    %c0_19 = arith.constant 0 : index
    %c0_20 = arith.constant 0 : index
    %33 = vector.load %arg8[%c0_19, %c0_20] : memref<8x128xf32, #tpu.memory_space<vmem>>, vector<8x128xf32>
    tpu.vector_store %arg8[%c0_19, %c0_20], %32 {strides = array<i32>} : memref<8x128xf32, #tpu.memory_space<vmem>>, vector<8x128xf32>,
    return
  }
  func.func @transform_0(%arg0: i32) -> (i32, i32) {
    %c0_i32 = arith.constant 0 : i32
    %c0_i32_0 = arith.constant 0 : i32
    return %arg0, %c0_i32 : i32, i32
  }
  func.func @transform_1(%arg0: i32) -> (i32, i32) {
    %c0_i32 = arith.constant 0 : i32
    %c0_i32_0 = arith.constant 0 : i32
    %c0_i32_1 = arith.constant 0 : i32
    return %c0_i32, %c0_i32_0 : i32, i32
  }
  func.func @transform_2(%arg0: i32) -> (i32, i32) {
    %c0_i32 = arith.constant 0 : i32
    %c0_i32_0 = arith.constant 0 : i32
    %c0_i32_1 = arith.constant 0 : i32
    return %c0_i32, %c0_i32_0 : i32, i32
  }
  func.func @transform_3(%arg0: i32) -> (i32, i32) {
    %c0_i32 = arith.constant 0 : i32
    %c0_i32_0 = arith.constant 0 : i32
    %c0_i32_1 = arith.constant 0 : i32
    return %c0_i32, %c0_i32_0 : i32, i32
  }
  func.func @transform_4(%arg0: i32) -> (i32, i32) {
    %c0_i32 = arith.constant 0 : i32
    %c0_i32_0 = arith.constant 0 : i32
    %c0_i32_1 = arith.constant 0 : i32
    return %c0_i32, %c0_i32_0 : i32, i32
  }
  func.func @transform_5(%arg0: i32) -> (i32, i32) {
    %c0_i32 = arith.constant 0 : i32
    %c0_i32_0 = arith.constant 0 : i32
    %c0_i32_1 = arith.constant 0 : i32
    return %c0_i32, %c0_i32_0 : i32, i32
  }
  func.func @transform_6(%arg0: i32) -> (i32, i32) {
    %c0_i32 = arith.constant 0 : i32
    %c0_i32_0 = arith.constant 0 : i32
    %c0_i32_1 = arith.constant 0 : i32
    return %c0_i32, %c0_i32_0 : i32, i32
  }
  func.func @transform_7(%arg0: i32) -> (i32, i32) {
    %c0_i32 = arith.constant 0 : i32
    %c0_i32_0 = arith.constant 0 : i32
    return %arg0, %c0_i32 : i32, i32
  }
}

</mosaic_0001>

<bundles_post_ra>
// kernel: tpu_custom_call.1
= control target key start
LH: loop header
LB: loop body
LE: loop exit
PB: predicated region body
PF: predicated region fallthrough
CT: control target
= control target key end

     0   :  { %12 = vsyncpa [#allocation3], 0  ;;  %s842_s0 = inlined_call_operand.hbm [shape: f32[8,32], index: 0, kind: input, shape index: {}]   ;;  %s843_s1 = inlined_call_operand.hbm [shape: f32[32,128], index: 1, kind: input, shape index: {}]   ;;  %s844_s2 = inlined_call_operand.vmem [shape: f32[1,128], index: 2, kind: input, shape index: {}]   ;;  %s845_s3 = inlined_call_operand.hbm [shape: f32[128,128], index: 3, kind: input, shape index: {}]   ;;  %s846_s4 = inlined_call_operand.vmem [shape: f32[1,128], index: 4, kind: input, shape index: {}]   ;;  %s847_s5 = inlined_call_operand.hbm [shape: f32[128,128], index: 5, kind: input, shape index: {}]   ;;  %s848_s6 = inlined_call_operand.vmem [shape: f32[1,128], index: 6, kind: input, shape index: {}]   ;;  %s849_s7 = inlined_call_operand.hbm [shape: f32[8,128], index: 7, kind: output, shape index: {}]  }
   0x1   :  { %13 = vsyncpa [#allocation6], 0 }
   0x2   :  { %14 = vsyncpa [#allocation9], 0 }
   0x3   :  { %15 = vsyncpa [#allocation4], 0  ;;  %s693_s24 = smov [#allocation5]   ;;  %s575_s28 = scalar_lea.hbm %s843_s1, 512 }
   0x4   :  { %s31_s25 = sshll.u32 %s693_s24, 4  ;;  %p576_p0 = scmp.ne.s32.totalorder %s843_s1, %s575_s28  ;;  %s32_s25 = int_to_ptr.vmem [resolvable:$true] %s31_s25 }
   0x5   :  { %p579_p1 = scmp.lt.u32.totalorder %s575_s28, %s843_s1 }
   0x7   :  { %p581_p2 = pnand %p579_p1, %p576_p0 }
   0x9   :  { %584 = shalt.err (!%p581_p2)
}
   0xa   :  { %s585_s10 = scalar_lea.vmem %s32_s25, 512  ;;  %p590_p4 = scmp.lt.s32.totalorder %s32_s25, %s32_s25 }
   0xb   :  { %p586_p3 = scmp.ne.s32.totalorder %s32_s25, %s585_s10  ;;  %p591_p5 = scmp.lt.s32.totalorder %s585_s10, %s585_s10 }
   0xd   :  { %p592_p6 = por %p591_p5, %p590_p4 }
   0xf   :  { %p593_p7 = pnand %p592_p6, %p586_p3 }
  0x11   :  { %596 = shalt.err (!%p593_p7)
}
  0x12   :  { %s694_s11 = smov 128   ;;  %s695_s12 = smov 8  }
  0x13   :  { %37 = dma.hbm_to_vmem [thread:$0]  %s843_s1, 512, %s32_s25, [#allocation6], %s694_s11, %s694_s11, %s695_s12  }
  0x14   :  { %s696_s15 = smov [#allocation2]   ;;  %s697_s17 = smov [#allocation7]  }
  0x15   :  { %s22_s16 = sshll.u32 %s696_s15, 4  ;;  %s45_s18 = sshll.u32 %s697_s17, 4  ;;  %s23_s16 = int_to_ptr.vmem [resolvable:$true] %s22_s16  ;;  %s46_s18 = int_to_ptr.vmem [resolvable:$true] %s45_s18 }
  0x16   :  { %s597_s21 = scalar_lea.hbm %s842_s0, 128 }
  0x17   :  { %p598_p8 = scmp.ne.s32.totalorder %s842_s0, %s597_s21  ;;  %p601_p9 = scmp.lt.u32.totalorder %s597_s21, %s842_s0 }
  0x19   :  { %p603_p10 = pnand %p601_p9, %p598_p8 }
  0x1b   :  { %606 = shalt.err (!%p603_p10)
}
  0x1c   :  { %s607_s1 = scalar_lea.vmem %s23_s16, 128  ;;  %p612_p12 = scmp.lt.s32.totalorder %s23_s16, %s23_s16 }
  0x1d   :  { %p608_p11 = scmp.ne.s32.totalorder %s23_s16, %s607_s1  ;;  %p613_p13 = scmp.lt.s32.totalorder %s607_s1, %s607_s1 }
  0x1f   :  { %p614_p0 = por %p613_p13, %p612_p12 }
  0x21   :  { %p615_p1 = pnand %p614_p0, %p608_p11 }
  0x23   :  { %618 = shalt.err (!%p615_p1)
}
  0x24   :  { %25 = dma.hbm_to_vmem [thread:$0]  %s842_s0, 128, %s23_s16, [#allocation3]  }
  0x25   :  { %s619_s30 = scalar_lea.hbm %s845_s3, 2048 }
  0x26   :  { %p620_p2 = scmp.ne.s32.totalorder %s845_s3, %s619_s30  ;;  %p623_p3 = scmp.lt.u32.totalorder %s619_s30, %s845_s3 }
  0x28   :  { %p625_p4 = pnand %p623_p3, %p620_p2 }
  0x2a   :  { %628 = shalt.err (!%p625_p4)
}
  0x2b   :  { %s629_s14 = scalar_lea.vmem %s46_s18, 2048  ;;  %p634_p6 = scmp.lt.s32.totalorder %s46_s18, %s46_s18 }
  0x2c   :  { %p630_p5 = scmp.ne.s32.totalorder %s46_s18, %s629_s14  ;;  %p635_p7 = scmp.lt.s32.totalorder %s629_s14, %s629_s14 }
  0x2e   :  { %p636_p8 = por %p635_p7, %p634_p6 }
  0x30   :  { %p637_p9 = pnand %p636_p8, %p630_p5 }
  0x32   :  { %640 = shalt.err (!%p637_p9)
}
  0x33   :  { %51 = dma.hbm_to_vmem [thread:$0]  %s845_s3, 2048, %s46_s18, [#allocation6], %s694_s11, %s694_s11, %s695_s12  }
  0x34   :  { %s698_s16 = smov [#allocation8]   ;;  %s641_s21 = scalar_lea.hbm %s847_s5, 2048 }
  0x35   :  { %s59_s17 = sshll.u32 %s698_s16, 4  ;;  %p642_p10 = scmp.ne.s32.totalorder %s847_s5, %s641_s21  ;;  %s60_s17 = int_to_ptr.vmem [resolvable:$true] %s59_s17 }
  0x36   :  { %p645_p11 = scmp.lt.u32.totalorder %s641_s21, %s847_s5 }
  0x38   :  { %p647_p12 = pnand %p645_p11, %p642_p10 }
  0x3a   :  { %650 = shalt.err (!%p647_p12)
}
  0x3b   :  { %s651_s1 = scalar_lea.vmem %s60_s17, 2048  ;;  %p656_p0 = scmp.lt.s32.totalorder %s60_s17, %s60_s17 }
  0x3c   :  { %p652_p13 = scmp.ne.s32.totalorder %s60_s17, %s651_s1  ;;  %p657_p1 = scmp.lt.s32.totalorder %s651_s1, %s651_s1 }
  0x3e   :  { %p658_p2 = por %p657_p1, %p656_p0 }
  0x40   :  { %p659_p3 = pnand %p658_p2, %p652_p13 }
  0x42   :  { %662 = shalt.err (!%p659_p3)
}
  0x43   :  { %65 = dma.hbm_to_vmem [thread:$0]  %s847_s5, 2048, %s60_s17, [#allocation9], %s694_s11, %s694_s11, %s695_s12  }
  0x44   :  { %685 = dma.done.wait [#allocation3], 128  }
  0x45   :  { %686 = vsyncadd [#allocation3], 4294967168 }
  0x46   :  { %687 = dma.done.wait [#allocation6], 2560  }
  0x47   :  { %688 = vsyncadd [#allocation6], 4294964736 }
  0x48   :  { %689 = dma.done.wait [#allocation9], 2048  }
  0x49   :  { %690 = vsyncadd [#allocation9], 4294965248  ;;  %v699_v0 = vmov 0.0|0.0   ;;  %vm700_vm0 = vmmov 0   ;;  %v701_v1 = vmov 0.0   ;;  %v81_v2 = vld [vmem:[#allocation5] sm:$0xff] }
  0x4a   :  { %507 = vmatprep.subr.bf16.mxu0 %v699_v0  ;;  %434 = vmatprep.mubr.msk.f32.mxu0 %vm700_vm0, %v701_v1  ;;  %v82_v3 = vld [vmem:[#allocation5 + $0x8] sm:$0xff]  ;;  %v83_v4 = vld [vmem:[#allocation5 + $0x10] sm:$0xff]  ;;  %v84_v6 = vld [vmem:[#allocation5 + $0x18] sm:$0xff]  ;;  %vm92_vm1 = vcmask 261120  }
  0x4b   :  { %513 = vmatprep.subr.bf16.mxu1 %v699_v0  ;;  %469 = vmatprep.mubr.msk.f32.mxu1 %vm700_vm0, %v701_v1  ;;  %v508_v5 = vpack.c.bf16 %v82_v3, %v81_v2  ;;  %v167_v7 = vld [vmem:[#allocation7] sm:$0xff]  ;;  %v168_v8 = vld [vmem:[#allocation7 + $0x8] sm:$0xff]  ;;  %v169_v9 = vld [vmem:[#allocation7 + $0x10] sm:$0xff]  ;;  %v511_v11 = vpack.c.bf16 %v84_v6, %v83_v4 }
  0x4c   :  { %v170_v10 = vld [vmem:[#allocation7 + $0x18] sm:$0xff]  ;;  %v514_v12 = vpack.c.bf16 %v168_v8, %v167_v7  ;;  %v171_v14 = vld [vmem:[#allocation7 + $0x20] sm:$0xff]  ;;  %v172_v15 = vld [vmem:[#allocation7 + $0x28] sm:$0xff] }
  0x4d   :  { %509 = vmatpush3.bf16.msra.mxu0 %v508_v5  ;;  %v517_v13 = vpack.c.bf16 %v170_v10, %v169_v9  ;;  %v80_v16 = vld [vmem:[#allocation2] sm:$0xff]  ;;  %v520_v17 = vpack.c.bf16 %v172_v15, %v171_v14  ;;  %v173_v18 = vld [vmem:[#allocation7 + $0x30] sm:$0xff]  ;;  %v175_v21 = vld [vmem:[#allocation7 + $0x40] sm:$0xff]  ;;  %v359_v10 = vlaneseq }
  0x4e   :  { %510 = vmatprep.subr.bf16.mxu0 %v699_v0  ;;  %515 = vmatpush3.bf16.msra.mxu1 %v514_v12  ;;  %v174_v19 = vld [vmem:[#allocation7 + $0x38] sm:$0xff]  ;;  %v176_v22 = vld [vmem:[#allocation7 + $0x48] sm:$0xff]  ;;  %v177_v24 = vld [vmem:[#allocation7 + $0x50] sm:$0xff] }
  0x4f   :  { %516 = vmatprep.subr.bf16.mxu1 %v699_v0  ;;  %v523_v20 = vpack.c.bf16 %v174_v19, %v173_v18  ;;  %v526_v23 = vpack.c.bf16 %v176_v22, %v175_v21  ;;  %v178_v25 = vld [vmem:[#allocation7 + $0x58] sm:$0xff]  ;;  %v179_v27 = vld [vmem:[#allocation7 + $0x60] sm:$0xff]  ;;  %v180_v28 = vld [vmem:[#allocation7 + $0x68] sm:$0xff]  ;;  %v360_v12 = vand.u32 127, %v359_v10 }
  0x50   :  { %v529_v26 = vpack.c.bf16 %v178_v25, %v177_v24  ;;  %v532_v29 = vpack.c.bf16 %v180_v28, %v179_v27  ;;  %v181_v30 = vld [vmem:[#allocation7 + $0x70] sm:$0xff]  ;;  %v182_v31 = vld [vmem:[#allocation7 + $0x78] sm:$0xff]  ;;  %v261_v33 = vld [vmem:[#allocation8] sm:$0xff] }
  0x51   :  { %512 = vmatpush3.bf16.msra.mxu0 %v511_v11  ;;  %v535_v32 = vpack.c.bf16 %v182_v31, %v181_v30  ;;  %v262_v34 = vld [vmem:[#allocation8 + $0x8] sm:$0xff]  ;;  %v263_v35 = vld [vmem:[#allocation8 + $0x10] sm:$0xff]  ;;  %v264_v37 = vld [vmem:[#allocation8 + $0x18] sm:$0xff]  ;;  %vm361_vm2 = vcmp.ge.s32.totalorder %v360_v12, 8  ;;  %vm362_vm3 = vcmp.lt.s32.totalorder %v360_v12, 16 }
  0x52   :  { %537 = vmatprep.subr.bf16.mxu0 %v699_v0  ;;  %518 = vmatpush3.bf16.msra.mxu1 %v517_v13  ;;  %v538_v36 = vpack.c.bf16 %v262_v34, %v261_v33  ;;  %v541_v38 = vpack.c.bf16 %v264_v37, %v263_v35  ;;  %v265_v39 = vld [vmem:[#allocation8 + $0x20] sm:$0xff]  ;;  %v266_v40 = vld [vmem:[#allocation8 + $0x28] sm:$0xff]  ;;  %v267_v42 = vld [vmem:[#allocation8 + $0x30] sm:$0xff] }
  0x53   :  { %519 = vmatprep.subr.bf16.mxu1 %v699_v0  ;;  %v544_v41 = vpack.c.bf16 %v266_v40, %v265_v39  ;;  %v268_v43 = vld [vmem:[#allocation8 + $0x38] sm:$0xff]  ;;  %v269_v45 = vld [vmem:[#allocation8 + $0x40] sm:$0xff]  ;;  %v270_v46 = vld [vmem:[#allocation8 + $0x48] sm:$0xff] }
  0x54   :  { %435 = vmatmul.mubr.msk.f32.vlgmr.msra.gmra.mrb[0].mxu0 %vm92_vm1, %v80_v16  ;;  %v547_v44 = vpack.c.bf16 %v268_v43, %v267_v42  ;;  %v550_v47 = vpack.c.bf16 %v270_v46, %v269_v45  ;;  %v271_v48 = vld [vmem:[#allocation8 + $0x50] sm:$0xff]  ;;  %v272_v49 = vld [vmem:[#allocation8 + $0x58] sm:$0xff]  ;;  %v273_v51 = vld [vmem:[#allocation8 + $0x60] sm:$0xff] }
  0x55   :  { %504 = vmatprep.mubr.msk.f32.mxu0 %vm700_vm0, %v701_v1  ;;  %539 = vmatpush3.bf16.msra.mxu0 %v538_v36  ;;  %v553_v50 = vpack.c.bf16 %v272_v49, %v271_v48  ;;  %v274_v52 = vld [vmem:[#allocation8 + $0x68] sm:$0xff]  ;;  %v383_v54 = vld [vmem:[%s844_s2] ss:$0 sm:$0xff]  ;;  %v275_v59 = vld [vmem:[#allocation8 + $0x70] sm:$0xff] }
  0x56   :  { %521 = vmatpush3.bf16.msra.mxu1 %v520_v17  ;;  %540 = vmatprep.subr.bf16.mxu0 %v699_v0  ;;  %v556_v53 = vpack.c.bf16 %v274_v52, %v273_v51  ;;  %v276_v60 = vld [vmem:[#allocation8 + $0x78] sm:$0xff]  ;;  %vm363_vm4 = vmand %vm361_vm2, %vm362_vm3 }
  0x57   :  { %522 = vmatprep.subr.bf16.mxu1 %v699_v0  ;;  %v559_v61 = vpack.c.bf16 %v276_v60, %v275_v59  ;;  %v385_v62 = vld [vmem:[%s846_s4] ss:$0 sm:$0xff]  ;;  %s702_s4 = smov [#allocation10]  }
  0x58   :  { %v386_v3 = vld [vmem:[%s848_s6] ss:$0 sm:$0xff]  ;;  %s372_s28 = sshll.u32 %s702_s4, 4  ;;  %s373_s28 = int_to_ptr.vmem [resolvable:$true] %s372_s28 }
  0x59   :  { %542 = vmatpush3.bf16.msra.mxu0 %v541_v38  ;;  %s663_s6 = scalar_lea.vmem %s373_s28, 128  ;;  %p668_p5 = scmp.lt.s32.totalorder %s373_s28, %s373_s28 }
  0x5a   :  { %524 = vmatpush3.bf16.msra.mxu1 %v523_v20  ;;  %543 = vmatprep.subr.bf16.mxu0 %v699_v0  ;;  %p664_p4 = scmp.ne.s32.totalorder %s373_s28, %s663_s6  ;;  %p669_p6 = scmp.lt.s32.totalorder %s663_s6, %s663_s6 }
  0x5b   :  { %525 = vmatprep.subr.bf16.mxu1 %v699_v0 }
  0x5c   :  { %p670_p7 = por %p669_p6, %p668_p5 }
  0x5d   :  { %545 = vmatpush3.bf16.msra.mxu0 %v544_v41 }
  0x5e   :  { %527 = vmatpush3.bf16.msra.mxu1 %v526_v23  ;;  %546 = vmatprep.subr.bf16.mxu0 %v699_v0  ;;  %p671_p8 = pnand %p670_p7, %p664_p4 }
  0x5f   :  { %528 = vmatprep.subr.bf16.mxu1 %v699_v0 }
  0x61   :  { %548 = vmatpush3.bf16.msra.mxu0 %v547_v44 }
  0x62   :  { %530 = vmatpush3.bf16.msra.mxu1 %v529_v26  ;;  %549 = vmatprep.subr.bf16.mxu0 %v699_v0 }
  0x63   :  { %531 = vmatprep.subr.bf16.mxu1 %v699_v0 }
  0x65   :  { %551 = vmatpush3.bf16.msra.mxu0 %v550_v47 }
  0x66   :  { %533 = vmatpush3.bf16.msra.mxu1 %v532_v29  ;;  %552 = vmatprep.subr.bf16.mxu0 %v699_v0 }
  0x67   :  { %534 = vmatprep.subr.bf16.mxu1 %v699_v0 }
  0x69   :  { %554 = vmatpush3.bf16.msra.mxu0 %v553_v50 }
  0x6a   :  { %536 = vmatpush3.bf16.msra.mxu1 %v535_v32  ;;  %555 = vmatprep.subr.bf16.mxu0 %v699_v0 }
  0x6d   :  { %557 = vmatpush3.bf16.msra.mxu0 %v556_v53 }
  0x6e   :  { %558 = vmatprep.subr.bf16.mxu0 %v699_v0 }
  0x71   :  { %560 = vmatpush3.bf16.msra.mxu0 %v559_v61 }
 0x127   :  { %v162_v55 = vpop.f32.mrb[0].mxu0 }
 0x128   :  { %v163_v56 = vadd.f32 %v383_v54, %v162_v55  ;;  %v436_v57 = vpop.f32.mrb[1].mxu0 }
 0x12a   :  { %v166_v58 = vmax.f32 %v163_v56, 0.0 }
 0x12c   :  { %470 = vmatmul.mubr.f32.vlgmr.msra.gmra.mrb[0].mxu1 %v166_v58 }
 0x1ff   :  { %v256_v63 = vpop.f32.mrb[0].mxu1 }
 0x200   :  { %v257_v1 = vadd.f32 %v385_v62, %v256_v63  ;;  %v471_v0 = vpop.f32.mrb[1].mxu1 }
 0x202   :  { %v260_v2 = vmax.f32 %v257_v1, 0.0 }
 0x204   :  { %505 = vmatmul.mubr.f32.vlgmr.msra.gmra.mrb[2].mxu0 %v260_v2 }
 0x2d7   :  { %v350_v4 = vpop.f32.mrb[2].mxu0 }
 0x2d8   :  { %v351_v5 = vadd.f32 %v386_v3, %v350_v4  ;;  %v506_v6 = vpop.f32.mrb[3].mxu0 }
 0x2da   :  { %571 = vtanh.f32 %v351_v5 }
 0x2e4   :  { %v572_v7 = vpop.eup %571 }
 0x2e5   :  { %v355_v8 = vmul.f32 6.0, %v572_v7 }
 0x2e7   :  { %v356_v9 = vadd.f32 -4.0, %v355_v8 }
 0x2e9   :  { %v357_v11 = vmul.f32 1.442695, %v356_v9 }
 0x2eb   :  { %573 = vpow2.f32 %v357_v11 }
 0x2f5   :  { %v574_v13 = vpop.eup %573 }
 0x2f6   :  { %v364_v14 = vsel %vm363_vm4, %v574_v13, %v351_v5 }
 0x2f7   :  { %365 = vst [vmem:[#allocation10] sm:$0xff] %v364_v14 }
 0x2f8   :  { %674 = shalt.err (!%p671_p8)
}
 0x2f9   :  { %s675_s8 = scalar_lea.hbm %s849_s7, 128 }
 0x2fa   :  { %p676_p9 = scmp.ne.s32.totalorder %s849_s7, %s675_s8  ;;  %p679_p10 = scmp.lt.u32.totalorder %s675_s8, %s849_s7 }
 0x2fc   :  { %p681_p11 = pnand %p679_p10, %p676_p9 }
 0x2fe   :  { %684 = shalt.err (!%p681_p11)
}
 0x2ff   :  { %375 = dma.vmem_to_hbm [thread:$0]  %s373_s28, 128, %s849_s7, [#allocation4]  }
 0x300   :  { %691 = dma.done.wait [#allocation4], 128  }
 0x301   :  { %692 = vsyncadd [#allocation4], 4294967168 }
 0x302   :  { %379 = vsyncpa [#allocation3], 1 }
 0x303   :  { %380 = vsyncpa [#allocation6], 1 }
 0x304   :  { %381 = vsyncpa [#allocation9], 1 }
 0x305   :  { %382 = vsyncpa [#allocation4], 1 }

</bundles_post_ra>
